<compile_context>
chip_gen: v7x
topology: tpu7x:2x2x1
jax: 0.10.0
libtpu: 0.0.40
codegen_flags: <defaults>
</compile_context>

<pallas_src>
import jax
import jax.numpy as jnp
from jax.experimental import pallas as pl
from jax.experimental.pallas import tpu as pltpu

_LANE = 128
_SUBLANE = 8


def _round_up(n, m):
    return ((n + m - 1) // m) * m


def policynet_kernel(x_ref, w1_ref, b1_ref, w2_ref, b2_ref, o_ref):
    # fc1 + ReLU (MXU + VPU); accumulate in f32 regardless of input dtype.
    h = jnp.dot(x_ref[...], w1_ref[...], preferred_element_type=jnp.float32)
    h = jnp.maximum(h + b1_ref[...], 0.0)
    # fc2 logits; padded action lanes carry a -1e30 bias -> exp() == 0 below.
    logits = jnp.dot(h.astype(w2_ref.dtype), w2_ref[...],
                     preferred_element_type=jnp.float32)
    logits = logits + b2_ref[...]
    # Numerically-stable softmax over the action (lane) axis: VPU + XLU + EUP.
    m = jnp.max(logits, axis=-1, keepdims=True)
    e = jnp.exp(logits - m)
    denom = jnp.sum(e, axis=-1, keepdims=True)
    o_ref[...] = (e / denom).astype(o_ref.dtype)


def policy_net_forward(x, w1_t, b1, w2_t, b2, *, block_b=512,
                       compute_dtype=jnp.float32):
    """x: (B, S); w1_t: (S, H); b1: (H,); w2_t: (H, A); b2: (A,).
    Returns softmax action probabilities (B, A) float32."""
    B, S = x.shape
    H = w1_t.shape[1]
    A = w2_t.shape[1]
    b1 = jnp.reshape(b1, (1, H)).astype(jnp.float32)
    b2 = jnp.reshape(b2, (1, A)).astype(jnp.float32)

    # Pad hidden / action dims to full 128-lane width (compute-free on the MXU,
    # removes masked-lane handling, makes the output store lane-dense).
    Hp = _round_up(H, _LANE)
    Ap = _round_up(A, _LANE)
    w1p = jnp.zeros((S, Hp), compute_dtype).at[:, :H].set(w1_t.astype(compute_dtype))
    b1p = jnp.zeros((1, Hp), jnp.float32).at[:, :H].set(b1)
    w2p = jnp.zeros((Hp, Ap), compute_dtype).at[:H, :A].set(w2_t.astype(compute_dtype))
    # Padded action lanes get a huge negative bias so softmax assigns them ~0.
    b2p = jnp.full((1, Ap), -1e30, jnp.float32).at[:, :A].set(b2)

    # Batch tile: multiple of 8 sublanes, capped so double-buffered blocks stay
    # well below scoped-VMEM defaults on every chip (v7x: 64 MiB physical).
    TB = min(block_b, _round_up(B, _SUBLANE))
    Bp = _round_up(B, TB)
    xp = jnp.zeros((Bp, S), compute_dtype).at[:B, :].set(x.astype(compute_dtype))

    out = pl.pallas_call(
        policynet_kernel,
        out_shape=jax.ShapeDtypeStruct((Bp, Ap), jnp.float32),
        grid=(Bp // TB,),
        in_specs=[
            pl.BlockSpec((TB, S), lambda i: (i, 0)),    # x: tiled over batch
            pl.BlockSpec((S, Hp), lambda i: (0, 0)),    # w1: resident in VMEM
            pl.BlockSpec((1, Hp), lambda i: (0, 0)),    # b1: resident
            pl.BlockSpec((Hp, Ap), lambda i: (0, 0)),   # w2: resident
            pl.BlockSpec((1, Ap), lambda i: (0, 0)),    # b2: resident
        ],
        out_specs=pl.BlockSpec((TB, Ap), lambda i: (i, 0)),  # lane-dense store
        compiler_params=pltpu.CompilerParams(
            dimension_semantics=("parallel",)),
    )(xp, w1p, b1p, w2p, b2p)
    return out[:B, :A]


def init_policy_net_params(key, state_dim, hidden_dim, action_dim):
    """Deterministic init mirroring torch.nn.Linear default U(-1/sqrt(fan_in), +)."""
    k1, k2, k3, k4 = jax.random.split(key, 4)
    bound1 = 1.0 / jnp.sqrt(state_dim)
    bound2 = 1.0 / jnp.sqrt(hidden_dim)
    # fc1.weight: (H, S) in torch; store transposed (S, H) for row-major dot.
    w1_t = jax.random.uniform(k1, (state_dim, hidden_dim), jnp.float32, -bound1, bound1)
    b1 = jax.random.uniform(k2, (hidden_dim,), jnp.float32, -bound1, bound1)
    # fc2.weight: (A, H) in torch; store transposed (H, A).
    w2_t = jax.random.uniform(k3, (hidden_dim, action_dim), jnp.float32, -bound2, bound2)
    b2 = jax.random.uniform(k4, (action_dim,), jnp.float32, -bound2, bound2)
    return w1_t, b1, w2_t, b2


if __name__ == "__main__":
    key = jax.random.PRNGKey(0)
    batch, state_dim, hidden_dim, action_dim = 8, 4, 32, 2

    k_x, k_p = jax.random.split(key)
    x = jax.random.normal(k_x, (batch, state_dim), jnp.float32)
    w1_t, b1, w2_t, b2 = init_policy_net_params(k_p, state_dim, hidden_dim, action_dim)

    out = policy_net_forward(x, w1_t, b1, w2_t, b2)
    out = jax.block_until_ready(out)

    # Pure-JAX reference (same math as the PyTorch module, outside Pallas).
    h_ref = jnp.maximum(x @ w1_t + b1[None, :], 0.0)
    ref = jax.nn.softmax(h_ref @ w2_t + b2[None, :], axis=1)

    assert out.shape == (batch, action_dim)
    assert jnp.allclose(out, ref, atol=1e-5, rtol=1e-5)
    assert jnp.allclose(jnp.sum(out, axis=1), 1.0, atol=1e-5)

    print("KERNEL_OK")
</pallas_src>

<mosaic_0001>
module attributes {stable_mosaic.version = 11 : i64} {
  func.func @policynet_kernel(%arg0: i32, %arg1: memref<8x4xf32, #tpu.memory_space<vmem>>, %arg2: memref<4x128xf32, #tpu.memory_space<vmem>>, %arg3: memref<1x128xf32, #tpu.memory_space<vmem>>, %arg4: memref<128x128xf32, #tpu.memory_space<vmem>>, %arg5: memref<1x128xf32, #tpu.memory_space<vmem>>, %arg6: memref<8x128xf32, #tpu.memory_space<vmem>>) attributes {dimension_semantics = [#tpu.dimension_semantics<parallel>], iteration_bounds = array<i64: 1>, scalar_prefetch = 0 : i64, scratch_operands = 0 : i64, tpu.core_type = #tpu.core_type<tc>, window_params = [{transform_indices = @transform_0, window_bounds = array<i64: 8, 4>}, {pipeline_mode = #tpu.pipeline_mode<synchronous>, transform_indices = @transform_1, window_bounds = array<i64: 4, 128>}, {pipeline_mode = #tpu.pipeline_mode<synchronous>, transform_indices = @transform_2, window_bounds = array<i64: 1, 128>}, {pipeline_mode = #tpu.pipeline_mode<synchronous>, transform_indices = @transform_3, window_bounds = array<i64: 128, 128>}, {pipeline_mode = #tpu.pipeline_mode<synchronous>, transform_indices = @transform_4, window_bounds = array<i64: 1, 128>}, {transform_indices = @transform_5, window_bounds = array<i64: 8, 128>}]} {
    %c0 = arith.constant 0 : index
    %c0_0 = arith.constant 0 : index
    %0 = vector.load %arg1[%c0, %c0_0] : memref<8x4xf32, #tpu.memory_space<vmem>>, vector<8x4xf32>
    %c0_1 = arith.constant 0 : index
    %c0_2 = arith.constant 0 : index
    %1 = vector.load %arg2[%c0_1, %c0_2] : memref<4x128xf32, #tpu.memory_space<vmem>>, vector<4x128xf32>
    %cst = arith.constant dense<0.000000e+00> : vector<8x128xf32>
    %2 = tpu.matmul %0, %1, %cst {dimension_numbers = #tpu.dot_dimension_numbers<[1], [0], [0], [1], [0, 0, 1, 1], [], []>} : vector<8x4xf32>, vector<4x128xf32>, vector<8x128xf32> -> vector<8x128xf32>
    %c0_3 = arith.constant 0 : index
    %c0_4 = arith.constant 0 : index
    %3 = vector.load %arg3[%c0_3, %c0_4] : memref<1x128xf32, #tpu.memory_space<vmem>>, vector<1x128xf32>
    %4 = vector.broadcast %3 : vector<1x128xf32> to vector<8x128xf32>
    %5 = arith.addf %2, %4 : vector<8x128xf32>
    %cst_5 = arith.constant 0.000000e+00 : f32
    %6 = vector.broadcast %cst_5 : f32 to vector<8x128xf32>
    %7 = arith.maximumf %5, %6 : vector<8x128xf32>
    %c0_6 = arith.constant 0 : index
    %c0_7 = arith.constant 0 : index
    %8 = vector.load %arg4[%c0_6, %c0_7] : memref<128x128xf32, #tpu.memory_space<vmem>>, vector<128x128xf32>
    %cst_8 = arith.constant dense<0.000000e+00> : vector<8x128xf32>
    %9 = tpu.matmul %7, %8, %cst_8 {dimension_numbers = #tpu.dot_dimension_numbers<[1], [0], [0], [1], [0, 0, 1, 1], [], []>} : vector<8x128xf32>, vector<128x128xf32>, vector<8x128xf32> -> vector<8x128xf32>
    %c0_9 = arith.constant 0 : index
    %c0_10 = arith.constant 0 : index
    %10 = vector.load %arg5[%c0_9, %c0_10] : memref<1x128xf32, #tpu.memory_space<vmem>>, vector<1x128xf32>
    %11 = vector.broadcast %10 : vector<1x128xf32> to vector<8x128xf32>
    %12 = arith.addf %9, %11 : vector<8x128xf32>
    %cst_11 = arith.constant dense<0xFF800000> : vector<8xf32>
    %13 = vector.multi_reduction <maximumf>, %12, %cst_11 [1] : vector<8x128xf32> to vector<8xf32>
    %14 = vector.shape_cast %13 : vector<8xf32> to vector<8x1xf32>
    %15 = vector.broadcast %14 : vector<8x1xf32> to vector<8x128xf32>
    %16 = arith.subf %12, %15 : vector<8x128xf32>
    %17 = math.exp %16 : vector<8x128xf32>
    %cst_12 = arith.constant dense<0.000000e+00> : vector<8xf32>
    %18 = vector.multi_reduction <add>, %17, %cst_12 [1] : vector<8x128xf32> to vector<8xf32>
    %19 = vector.shape_cast %18 : vector<8xf32> to vector<8x1xf32>
    %20 = vector.broadcast %19 : vector<8x1xf32> to vector<8x128xf32>
    %21 = arith.divf %17, %20 : vector<8x128xf32>
    %c0_13 = arith.constant 0 : index
    %c0_14 = arith.constant 0 : index
    %22 = vector.load %arg6[%c0_13, %c0_14] : memref<8x128xf32, #tpu.memory_space<vmem>>, vector<8x128xf32>
    tpu.vector_store %arg6[%c0_13, %c0_14], %21 {strides = array<i32>} : memref<8x128xf32, #tpu.memory_space<vmem>>, vector<8x128xf32>,
    return
  }
  func.func @transform_0(%arg0: i32) -> (i32, i32) {
    %c0_i32 = arith.constant 0 : i32
    %c0_i32_0 = arith.constant 0 : i32
    return %arg0, %c0_i32 : i32, i32
  }
  func.func @transform_1(%arg0: i32) -> (i32, i32) {
    %c0_i32 = arith.constant 0 : i32
    %c0_i32_0 = arith.constant 0 : i32
    %c0_i32_1 = arith.constant 0 : i32
    return %c0_i32, %c0_i32_0 : i32, i32
  }
  func.func @transform_2(%arg0: i32) -> (i32, i32) {
    %c0_i32 = arith.constant 0 : i32
    %c0_i32_0 = arith.constant 0 : i32
    %c0_i32_1 = arith.constant 0 : i32
    return %c0_i32, %c0_i32_0 : i32, i32
  }
  func.func @transform_3(%arg0: i32) -> (i32, i32) {
    %c0_i32 = arith.constant 0 : i32
    %c0_i32_0 = arith.constant 0 : i32
    %c0_i32_1 = arith.constant 0 : i32
    return %c0_i32, %c0_i32_0 : i32, i32
  }
  func.func @transform_4(%arg0: i32) -> (i32, i32) {
    %c0_i32 = arith.constant 0 : i32
    %c0_i32_0 = arith.constant 0 : i32
    %c0_i32_1 = arith.constant 0 : i32
    return %c0_i32, %c0_i32_0 : i32, i32
  }
  func.func @transform_5(%arg0: i32) -> (i32, i32) {
    %c0_i32 = arith.constant 0 : i32
    %c0_i32_0 = arith.constant 0 : i32
    return %arg0, %c0_i32 : i32, i32
  }
}

</mosaic_0001>

<bundles_post_ra>
// kernel: tpu_custom_call.1
= control target key start
LH: loop header
LB: loop body
LE: loop exit
PB: predicated region body
PF: predicated region fallthrough
CT: control target
= control target key end

     0   :  { %10 = vsyncpa [#allocation3], 0  ;;  %s460_s0 = inlined_call_operand.vmem [shape: f32[8,4], index: 0, kind: input, shape index: {}]   ;;  %s461_s1 = inlined_call_operand.vmem [shape: f32[4,128], index: 1, kind: input, shape index: {}]   ;;  %s462_s2 = inlined_call_operand.vmem [shape: f32[1,128], index: 2, kind: input, shape index: {}]   ;;  %s463_s3 = inlined_call_operand.hbm [shape: f32[128,128], index: 3, kind: input, shape index: {}]   ;;  %s464_s4 = inlined_call_operand.vmem [shape: f32[1,128], index: 4, kind: input, shape index: {}]   ;;  %s465_s5 = inlined_call_operand.hbm [shape: f32[8,128], index: 5, kind: output, shape index: {}]  }
   0x1   :  { %11 = vsyncpa [#allocation4], 0  ;;  %s387_s18 = smov [#allocation2]   ;;  %s339_s22 = scalar_lea.hbm %s463_s3, 2048 }
   0x2   :  { %s23_s19 = sshll.u32 %s387_s18, 4  ;;  %p340_p0 = scmp.ne.s32.totalorder %s463_s3, %s339_s22  ;;  %s24_s19 = int_to_ptr.vmem [resolvable:$true] %s23_s19 }
   0x3   :  { %p343_p1 = scmp.lt.u32.totalorder %s339_s22, %s463_s3 }
   0x5   :  { %p345_p2 = pnand %p343_p1, %p340_p0 }
   0x7   :  { %348 = shalt.err (!%p345_p2)
}
   0x8   :  { %s349_s27 = scalar_lea.vmem %s24_s19, 2048  ;;  %p354_p4 = scmp.lt.s32.totalorder %s24_s19, %s24_s19 }
   0x9   :  { %p350_p3 = scmp.ne.s32.totalorder %s24_s19, %s349_s27  ;;  %p355_p5 = scmp.lt.s32.totalorder %s349_s27, %s349_s27 }
   0xb   :  { %p356_p6 = por %p355_p5, %p354_p4 }
   0xd   :  { %p357_p7 = pnand %p356_p6, %p350_p3 }
   0xf   :  { %360 = shalt.err (!%p357_p7)
}
  0x10   :  { %s388_s28 = smov 128   ;;  %s389_s29 = smov 8  }
  0x11   :  { %29 = dma.hbm_to_vmem [thread:$0]  %s463_s3, 2048, %s24_s19, [#allocation3], %s388_s28, %s388_s28, %s389_s29  }
  0x12   :  { %383 = dma.done.wait [#allocation3], 2048  }
  0x13   :  { %384 = vsyncadd [#allocation3], 4294965248  ;;  %v390_v0 = vmov 0.0   ;;  %vm391_vm0 = vmmov 0   ;;  %v392_v1 = vmov 0.0|0.0   ;;  %vm48_vm1 = vcmask 1043456  }
  0x14   :  { %264 = vmatprep.subr.mxu0 %v390_v0  ;;  %266 = vmatprep.mubr.msk.f32.mxu0 %vm391_vm0, %v390_v0  ;;  %vm44_vm2 = vcmask 31744   ;;  %v36_v2 = vld [vmem:[%s461_s1] sm:$0xf]  ;;  %v124_v5 = vld [vmem:[#allocation2 + $0x8] sm:$0xff]  ;;  %v125_v6 = vld [vmem:[#allocation2 + $0x10] sm:$0xff] }
  0x15   :  { %304 = vmatprep.subr.bf16.mxu1 %v392_v1  ;;  %301 = vmatprep.mubr.msk.f32.mxu1 %vm391_vm0, %v390_v0  ;;  %v35_v3 = vld [vmem:[%s460_s0] sm:$0xff]  ;;  %v126_v7 = vld [vmem:[#allocation2 + $0x18] sm:$0xff]  ;;  %v128_v11 = vld [vmem:[#allocation2 + $0x28] sm:$0xff] }
  0x16   :  { %v123_v4 = vld [vmem:[#allocation2] sm:$0xff]  ;;  %265 = vmatpush3.msk.msra.mxu0 %vm48_vm1, %v36_v2  ;;  %v308_v9 = vpack.c.bf16 %v126_v7, %v125_v6  ;;  %v129_v13 = vld [vmem:[#allocation2 + $0x30] sm:$0xff]  ;;  %v130_v14 = vld [vmem:[#allocation2 + $0x38] sm:$0xff] }
  0x17   :  { %267 = vmatmul.mubr.msk.f32.vlgmr.msra.gmra.mrb[0].mxu0 %vm44_vm2, %v35_v3  ;;  %v305_v8 = vpack.c.bf16 %v124_v5, %v123_v4  ;;  %v127_v10 = vld [vmem:[#allocation2 + $0x20] sm:$0xff]  ;;  %v314_v15 = vpack.c.bf16 %v130_v14, %v129_v13  ;;  %v132_v17 = vld [vmem:[#allocation2 + $0x48] sm:$0xff]  ;;  %v133_v19 = vld [vmem:[#allocation2 + $0x50] sm:$0xff] }
  0x18   :  { %v311_v12 = vpack.c.bf16 %v128_v11, %v127_v10  ;;  %v131_v16 = vld [vmem:[#allocation2 + $0x40] sm:$0xff]  ;;  %v134_v20 = vld [vmem:[#allocation2 + $0x58] sm:$0xff]  ;;  %v136_v23 = vld [vmem:[#allocation2 + $0x68] sm:$0xff] }
  0x19   :  { %306 = vmatpush3.bf16.msra.mxu1 %v305_v8  ;;  %v317_v18 = vpack.c.bf16 %v132_v17, %v131_v16  ;;  %v320_v21 = vpack.c.bf16 %v134_v20, %v133_v19  ;;  %v135_v22 = vld [vmem:[#allocation2 + $0x60] sm:$0xff]  ;;  %v137_v25 = vld [vmem:[#allocation2 + $0x70] sm:$0xff]  ;;  %v138_v26 = vld [vmem:[#allocation2 + $0x78] sm:$0xff] }
  0x1a   :  { %307 = vmatprep.subr.bf16.mxu1 %v392_v1  ;;  %v323_v24 = vpack.c.bf16 %v136_v23, %v135_v22  ;;  %v326_v27 = vpack.c.bf16 %v138_v26, %v137_v25  ;;  %v241_v28 = vld [vmem:[%s462_s2] ss:$0 sm:$0xff]  ;;  %s393_s2 = smov [#allocation5]  }
  0x1b   :  { %v244_v33 = vld [vmem:[%s464_s4] ss:$0 sm:$0xff]  ;;  %s232_s12 = sshll.u32 %s393_s2, 4  ;;  %s233_s12 = int_to_ptr.vmem [resolvable:$true] %s232_s12 }
  0x1c   :  { %s361_s13 = scalar_lea.vmem %s233_s12, 128  ;;  %p366_p9 = scmp.lt.s32.totalorder %s233_s12, %s233_s12 }
  0x1d   :  { %309 = vmatpush3.bf16.msra.mxu1 %v308_v9  ;;  %p362_p8 = scmp.ne.s32.totalorder %s233_s12, %s361_s13  ;;  %p367_p10 = scmp.lt.s32.totalorder %s361_s13, %s361_s13 }
  0x1e   :  { %310 = vmatprep.subr.bf16.mxu1 %v392_v1 }
  0x1f   :  { %p368_p11 = por %p367_p10, %p366_p9 }
  0x21   :  { %312 = vmatpush3.bf16.msra.mxu1 %v311_v12  ;;  %p369_p12 = pnand %p368_p11, %p362_p8 }
  0x22   :  { %313 = vmatprep.subr.bf16.mxu1 %v392_v1 }
  0x25   :  { %315 = vmatpush3.bf16.msra.mxu1 %v314_v15 }
  0x26   :  { %316 = vmatprep.subr.bf16.mxu1 %v392_v1 }
  0x29   :  { %318 = vmatpush3.bf16.msra.mxu1 %v317_v18 }
  0x2a   :  { %319 = vmatprep.subr.bf16.mxu1 %v392_v1 }
  0x2d   :  { %321 = vmatpush3.bf16.msra.mxu1 %v320_v21 }
  0x2e   :  { %322 = vmatprep.subr.bf16.mxu1 %v392_v1 }
  0x31   :  { %324 = vmatpush3.bf16.msra.mxu1 %v323_v24 }
  0x32   :  { %325 = vmatprep.subr.bf16.mxu1 %v392_v1 }
  0x35   :  { %327 = vmatpush3.bf16.msra.mxu1 %v326_v27 }
  0xea   :  { %v118_v29 = vpop.f32.mrb[0].mxu0 }
  0xeb   :  { %v119_v30 = vadd.f32 %v241_v28, %v118_v29  ;;  %v268_v31 = vpop.f32.mrb[1].mxu0 }
  0xed   :  { %v122_v32 = vmax.f32 %v119_v30, 0.0 }
  0xef   :  { %302 = vmatmul.mubr.f32.vlgmr.msra.gmra.mrb[0].mxu1 %v122_v32 }
 0x1c2   :  { %v212_v34 = vpop.f32.mrb[0].mxu1 }
 0x1c3   :  { %v213_v35 = vadd.f32 %v244_v33, %v212_v34  ;;  %v303_v36 = vpop.f32.mrb[1].mxu1 }
 0x1c5   :  { %216 = vmax.xlane.f32.xlu0 %v213_v35 }
 0x252   :  { %v217_v37 = vpop.xlane.xlu0 %216 }
 0x253   :  { %v218_v38 = vsub.f32 %v213_v35, %v217_v37 }
 0x255   :  { %v219_v39 = vmul.f32 1.442695, %v218_v38 }
 0x257   :  { %335 = vpow2.f32 %v219_v39 }
 0x261   :  { %v336_v40 = vpop.eup %335 }
 0x262   :  { %221 = vadd.xlane.f32.xlu0 %v336_v40 }
 0x2ef   :  { %v222_v41 = vpop.xlane.xlu0 %221 }
 0x2f0   :  { %337 = vrcp.f32 %v222_v41 }
 0x2fa   :  { %v338_v42 = vpop.eup %337 }
 0x2fb   :  { %v224_v43 = vmul.f32 %v338_v42, %v336_v40 }
 0x2fd   :  { %225 = vst [vmem:[#allocation5] sm:$0xff] %v224_v43 }
 0x2fe   :  { %372 = shalt.err (!%p369_p12)
}
 0x2ff   :  { %s373_s15 = scalar_lea.hbm %s465_s5, 128 }
 0x300   :  { %p374_p13 = scmp.ne.s32.totalorder %s465_s5, %s373_s15  ;;  %p377_p0 = scmp.lt.u32.totalorder %s373_s15, %s465_s5 }
 0x302   :  { %p379_p1 = pnand %p377_p0, %p374_p13 }
 0x304   :  { %382 = shalt.err (!%p379_p1)
}
 0x305   :  { %235 = dma.vmem_to_hbm [thread:$0]  %s233_s12, 128, %s465_s5, [#allocation4]  }
 0x306   :  { %385 = dma.done.wait [#allocation4], 128  }
 0x307   :  { %386 = vsyncadd [#allocation4], 4294967168 }
 0x308   :  { %239 = vsyncpa [#allocation3], 1 }
 0x309   :  { %240 = vsyncpa [#allocation4], 1 }

</bundles_post_ra>
